<compile_context>
chip_gen: v6e
topology: v6e:2x2x1
jax: 0.10.0
libtpu: 0.0.40
codegen_flags: <defaults>
</compile_context>

<pallas_src>
import functools

import jax
import jax.numpy as jnp
from jax import lax
from jax.experimental import pallas as pl
from jax.experimental.pallas import tpu as pltpu


# ------------------------------ fused kernel --------------------------------


def _fused_block_kernel(x_ref, t1_ref, b1_ref, t2_ref, b2_ref, g_ref,
                        beta_ref, o_ref, *, r, L, neg_slope):
    """Whole block on one image, in a row-folded, shuffle-packed 2-D layout.

    Layouts (all lane-dense, no in-kernel reshape/transpose):
      input   : (H, W*Cin)
      stage A : (H, 2*r*L)   columns = [sub group 0..r-1 | id group 0..r-1]
      stage B+: (H, r*L)     lane group i of width L = shuffled row h*r + i
    Vertical taps = pltpu.roll on sublanes + border-row mask; horizontal taps,
    channel mixing and the pixel-shuffle column permutation are folded into
    the banded block-Toeplitz weights built once in the wrapper.
    """
    f32 = jnp.float32
    bf16 = jnp.bfloat16
    rL = r * L

    x = x_ref[0].astype(f32)                                   # (H, W*Cin)
    H = x.shape[0]

    # ---- stage A: merged subpel + upsample conv3x3, single K=3*W*Cin dot ----
    rows = lax.broadcasted_iota(jnp.int32, x.shape, 0)
    x_dn = jnp.where(rows == 0, 0.0, pltpu.roll(x, 1, 0))          # row h-1
    x_up = jnp.where(rows == H - 1, 0.0, pltpu.roll(x, H - 1, 0))  # row h+1
    x_cat = jnp.concatenate([x_dn, x, x_up], axis=1).astype(bf16)  # (H,3*W*Cin)
    acc1 = b1_ref[...] + jnp.dot(x_cat, t1_ref[...],
                                 preferred_element_type=f32)       # (H, 2*rL)

    sub = acc1[:, :rL]                      # subpel branch, shuffle-packed
    identity = acc1[:, rL:]                 # upsample branch, shuffle-packed
    sub = jnp.where(sub >= 0.0, sub, neg_slope * sub)              # LeakyReLU

    # ---- stage B: conv3x3 on the upsampled map, single K=(r+2)*L dot ----
    # Vertical neighbours that stay in the same packed row are handled inside
    # t2; the two taps that cross a packed-row boundary come from +/-1 row
    # rolls of the edge lane groups (zeroed at the image border).
    rows2 = lax.broadcasted_iota(jnp.int32, sub.shape, 0)
    s_dn = jnp.where(rows2 == 0, 0.0, pltpu.roll(sub, 1, 0))
    s_up = jnp.where(rows2 == H - 1, 0.0, pltpu.roll(sub, H - 1, 0))
    s_cat = jnp.concatenate(
        [sub, s_dn[:, (r - 1) * L:], s_up[:, :L]], axis=1).astype(bf16)
    y = b2_ref[...] + jnp.dot(s_cat, t2_ref[...],
                              preferred_element_type=f32)          # (H, rL)

    # ---- stage C: inverse GDN (block-diag gamma matmul + sqrt) + residual ----
    norm = jnp.dot((y * y).astype(bf16), g_ref[...],
                   preferred_element_type=f32) + beta_ref[...]
    out = y * jnp.sqrt(norm) + identity
    o_ref[0] = out.astype(o_ref.dtype)                             # (H, rL)


# --------------------------- wrapper-side operands ---------------------------


def _shuffle_permute(w, b, Cout, r):
    """Permute subpel-conv output channels (HWIO) so PixelShuffle channel
    k = c*r^2 + i*r + j becomes group i, lane j*Cout + c."""
    Cin = w.shape[2]
    w6 = w.reshape(3, 3, Cin, Cout, r, r)            # (dy, dx, ci, c, i, j)
    w6 = jnp.transpose(w6, (0, 1, 2, 4, 5, 3))       # (dy, dx, ci, i, j, c)
    w_perm = w6.reshape(3, 3, Cin, r, r * Cout)
    b_perm = jnp.transpose(b.reshape(Cout, r, r), (1, 2, 0)).reshape(r, r * Cout)
    return w_perm, b_perm


def _band_matrix(w_dx_ci_k, width):
    """Banded block-Toeplitz matrix for the horizontal taps of a 3-tap,
    stride-1, zero-padded conv in row-folded form.  w_dx_ci_k: (3, Cin, K),
    result: (width*Cin, width*K)."""
    return sum(jnp.kron(jnp.eye(width, width, k=1 - dx, dtype=w_dx_ci_k.dtype),
                        w_dx_ci_k[dx])
               for dx in range(3))


def prepare_operands(p, W, Cout, r):
    """Fold conv weights / pixel shuffle / gamma into MXU-ready bf16 matrices.
    Call ONCE at model-load time (hoisted out of the per-forward path)."""
    f32, bf16 = jnp.float32, jnp.bfloat16
    W2 = W * r
    L = W2 * Cout
    rL = r * L

    sub_w, sub_b = _shuffle_permute(p["subpel_w"].astype(f32),
                                    p["subpel_b"].astype(f32), Cout, r)
    up_w, up_b = _shuffle_permute(p["up_w"].astype(f32),
                                  p["up_b"].astype(f32), Cout, r)

    # stage A: rows = [dy=0 | dy=1 | dy=2] blocks of W*Cin; columns =
    # [sub group 0..r-1 | upsample group 0..r-1], each group L lanes wide.
    t1 = jnp.concatenate([
        jnp.concatenate(
            [_band_matrix(sub_w[dy, :, :, i, :], W) for i in range(r)] +
            [_band_matrix(up_w[dy, :, :, i, :], W) for i in range(r)], axis=1)
        for dy in range(3)], axis=0)                        # (3*W*Cin, 2*rL)
    b1 = jnp.concatenate([jnp.tile(sub_b[i], W) for i in range(r)] +
                         [jnp.tile(up_b[i], W) for i in range(r)]
                         ).reshape(1, 2 * rL)

    # stage B: one (rL + 2L, rL) weight.  Rows 0:rL act on the packed sub map
    # (within-row vertical taps), the last 2L rows act on the +/-1 row-rolled
    # edge groups (cross-row vertical taps).
    w2 = p["conv_w"].astype(f32)
    band2 = [_band_matrix(w2[dy], W2) for dy in range(3)]   # each (L, L)
    t2_same = jnp.zeros((rL, rL), f32)
    for i in range(r):                                       # output group i
        for off in (-1, 0, 1):                               # input row offset
            src = i + off
            if 0 <= src < r:
                t2_same = t2_same.at[src * L:(src + 1) * L,
                                     i * L:(i + 1) * L].set(band2[off + 1])
    t2_dn = jnp.zeros((L, rL), f32).at[:, :L].set(band2[0])            # group r-1, row h-1
    t2_up = jnp.zeros((L, rL), f32).at[:, (r - 1) * L:].set(band2[2])  # group 0,   row h+1
    t2 = jnp.concatenate([t2_same, t2_dn, t2_up], axis=0)   # ((r+2)*L, rL)
    b2 = jnp.tile(p["conv_b"].astype(f32), r * W2).reshape(1, rL)

    # inverse GDN: block-diag(gamma^T) over all packed pixel positions.
    g = jnp.kron(jnp.eye(r * W2, dtype=f32), p["gamma"].astype(f32).T)  # (rL, rL)
    beta = jnp.tile(p["beta"].astype(f32), r * W2).reshape(1, rL)

    return dict(t1=t1.astype(bf16), b1=b1, t2=t2.astype(bf16), b2=b2,
                g=g.astype(bf16), beta=beta)


@functools.partial(jax.jit, static_argnames=("r",))
def residual_block_upsample(x_nhwc, ops, *, r=2):
    """Fused ResidualBlockUpsample forward (NHWC in / NHWC out)."""
    N, H, W, Cin = x_nhwc.shape
    rL = ops["g"].shape[0]
    L = rL // r
    Cout = L // (W * r)
    H2, W2 = H * r, W * r

    x2d = x_nhwc.reshape(N, H, W * Cin)              # row-folded, free reshape

    kern = functools.partial(_fused_block_kernel, r=r, L=L, neg_slope=0.01)

    out2d = pl.pallas_call(
        kern,
        out_shape=jax.ShapeDtypeStruct((N, H, rL), x_nhwc.dtype),
        grid_spec=pltpu.PrefetchScalarGridSpec(
            num_scalar_prefetch=0,
            grid=(N,),
            in_specs=[
                pl.BlockSpec((1, H, W * Cin), lambda n: (n, 0, 0)),
                pl.BlockSpec((3 * W * Cin, 2 * rL), lambda n: (0, 0)),
                pl.BlockSpec((1, 2 * rL), lambda n: (0, 0)),
                pl.BlockSpec(((r + 2) * L, rL), lambda n: (0, 0)),
                pl.BlockSpec((1, rL), lambda n: (0, 0)),
                pl.BlockSpec((rL, rL), lambda n: (0, 0)),
                pl.BlockSpec((1, rL), lambda n: (0, 0)),
            ],
            out_specs=pl.BlockSpec((1, H, rL), lambda n: (n, 0, 0)),
        ),
        compiler_params=pltpu.CompilerParams(
            dimension_semantics=("parallel",),
            vmem_limit_bytes=64 * 1024 * 1024),
    )(x2d, ops["t1"], ops["b1"], ops["t2"], ops["b2"], ops["g"], ops["beta"])

    # Packed layout -> pixel-shuffled image: a FREE contiguous reshape
    # (lane group i of packed row h IS output row h*r + i).
    return out2d.reshape(N, H2, W2, Cout)


# -------------------------- pure-JAX reference ------------------------------


def pixel_shuffle_nhwc(x, r):
    N, H, W, Cr2 = x.shape
    C = Cr2 // (r * r)
    x = x.reshape(N, H, W, C, r, r)
    x = x.transpose(0, 1, 4, 2, 5, 3)
    return x.reshape(N, H * r, W * r, C)


def residual_block_upsample_ref(x_nhwc, p, r=2):
    def conv(x, w, b):
        y = jax.lax.conv_general_dilated(
            x, w, window_strides=(1, 1), padding=((1, 1), (1, 1)),
            dimension_numbers=("NHWC", "HWIO", "NHWC"),
            precision=jax.lax.Precision.HIGHEST)
        return y + b
    out = pixel_shuffle_nhwc(conv(x_nhwc, p["subpel_w"], p["subpel_b"]), r)
    out = jnp.where(out >= 0, out, 0.01 * out)
    out = conv(out, p["conv_w"], p["conv_b"])
    norm = jnp.einsum("nhwj,ij->nhwi", out * out, p["gamma"],
                      precision=jax.lax.Precision.HIGHEST) + p["beta"]
    out = out * jnp.sqrt(norm)
    identity = pixel_shuffle_nhwc(conv(x_nhwc, p["up_w"], p["up_b"]), r)
    return out + identity


# ---------------------------------- main -------------------------------------


if __name__ == "__main__":
    in_ch, out_ch, r = 4, 4, 2
    N, H, W = 2, 16, 16

    ks = jax.random.split(jax.random.PRNGKey(0), 9)

    params = {
        # subpel_conv: Conv2d(in_ch, out_ch*r^2, 3, pad=1) -> HWIO (3,3,Cin,Cout*r^2)
        "subpel_w": 0.1 * jax.random.normal(ks[0], (3, 3, in_ch, out_ch * r * r), jnp.float32),
        "subpel_b": 0.1 * jax.random.normal(ks[1], (out_ch * r * r,), jnp.float32),
        # conv3x3(out_ch, out_ch)
        "conv_w": 0.1 * jax.random.normal(ks[2], (3, 3, out_ch, out_ch), jnp.float32),
        "conv_b": 0.1 * jax.random.normal(ks[3], (out_ch,), jnp.float32),
        # upsample: Conv2d(in_ch, out_ch*r^2, 3, pad=1)
        "up_w": 0.1 * jax.random.normal(ks[4], (3, 3, in_ch, out_ch * r * r), jnp.float32),
        "up_b": 0.1 * jax.random.normal(ks[5], (out_ch * r * r,), jnp.float32),
        # inverse GDN parameters (positive)
        "beta": 1.0 + 0.1 * jax.random.uniform(ks[6], (out_ch,), jnp.float32),
        "gamma": 0.1 * jnp.eye(out_ch, dtype=jnp.float32)
                 + 0.01 * jax.random.uniform(ks[7], (out_ch, out_ch), jnp.float32),
    }

    # Input follows the PyTorch NCHW convention, permuted to NHWC for TPU.
    x_nchw = jax.random.normal(ks[8], (N, in_ch, H, W), jnp.float32)
    x_nhwc = jnp.transpose(x_nchw, (0, 2, 3, 1))

    # Operand folding hoisted out of the forward path (done once).
    ops = prepare_operands(params, W, out_ch, r)
    ops = jax.tree_util.tree_map(jax.block_until_ready, ops)

    out_nhwc = residual_block_upsample(x_nhwc, ops, r=r)
    out_nhwc = jax.block_until_ready(out_nhwc)
    out_nchw = jnp.transpose(out_nhwc, (0, 3, 1, 2))   # back to PyTorch layout

    ref_nhwc = residual_block_upsample_ref(x_nhwc, params, r=r)
    max_err = float(jnp.max(jnp.abs(out_nhwc - ref_nhwc)))
    rel_err = float(jnp.linalg.norm(out_nhwc - ref_nhwc) /
                    jnp.linalg.norm(ref_nhwc))
    assert out_nchw.shape == (N, out_ch, H * r, W * r), out_nchw.shape
    # bf16 MXU operands -> expect ~1e-3..1e-2 abs error; a layout/permutation
    # bug would give O(1) relative error, which the rel_err check catches.
    if max_err > 2e-2 or rel_err > 1e-2:
        raise AssertionError(
            f"Pallas output mismatch: max abs err = {max_err}, rel err = {rel_err}")

    print("KERNEL_OK")
</pallas_src>

<mosaic_0001>
module attributes {stable_mosaic.version = 11 : i64} {
  func.func @_fused_block_kernel(%arg0: i32, %arg1: memref<1x16x64xf32, #tpu.memory_space<vmem>>, %arg2: memref<192x512xbf16, #tpu.memory_space<vmem>>, %arg3: memref<1x512xf32, #tpu.memory_space<vmem>>, %arg4: memref<512x256xbf16, #tpu.memory_space<vmem>>, %arg5: memref<1x256xf32, #tpu.memory_space<vmem>>, %arg6: memref<256x256xbf16, #tpu.memory_space<vmem>>, %arg7: memref<1x256xf32, #tpu.memory_space<vmem>>, %arg8: memref<1x16x256xf32, #tpu.memory_space<vmem>>) attributes {dimension_semantics = [#tpu.dimension_semantics<parallel>], iteration_bounds = array<i64: 2>, scalar_prefetch = 0 : i64, scratch_operands = 0 : i64, tpu.core_type = #tpu.core_type<tc>, window_params = [{transform_indices = @transform_0, window_bounds = array<i64: 1, 16, 64>}, {pipeline_mode = #tpu.pipeline_mode<synchronous>, transform_indices = @transform_1, window_bounds = array<i64: 192, 512>}, {pipeline_mode = #tpu.pipeline_mode<synchronous>, transform_indices = @transform_2, window_bounds = array<i64: 1, 512>}, {pipeline_mode = #tpu.pipeline_mode<synchronous>, transform_indices = @transform_3, window_bounds = array<i64: 512, 256>}, {pipeline_mode = #tpu.pipeline_mode<synchronous>, transform_indices = @transform_4, window_bounds = array<i64: 1, 256>}, {pipeline_mode = #tpu.pipeline_mode<synchronous>, transform_indices = @transform_5, window_bounds = array<i64: 256, 256>}, {pipeline_mode = #tpu.pipeline_mode<synchronous>, transform_indices = @transform_6, window_bounds = array<i64: 1, 256>}, {transform_indices = @transform_7, window_bounds = array<i64: 1, 16, 256>}]} {
    %c0 = arith.constant 0 : index
    %c0_0 = arith.constant 0 : index
    %c0_1 = arith.constant 0 : index
    %0 = vector.load %arg1[%c0, %c0_0, %c0_1] : memref<1x16x64xf32, #tpu.memory_space<vmem>>, vector<1x16x64xf32>
    %1 = vector.shape_cast %0 : vector<1x16x64xf32> to vector<16x64xf32>
    %2 = tpu.iota {dimensions = array<i32: 0>} : vector<16x64xi32>
    %c0_i32 = arith.constant 0 : i32
    %3 = vector.broadcast %c0_i32 : i32 to vector<16x64xi32>
    %4 = arith.cmpi eq, %2, %3 : vector<16x64xi32>
    %c1_i32 = arith.constant 1 : i32
    %5 = tpu.dynamic_rotate %1 by %c1_i32 dim 0 : vector<16x64xf32>, i32 -> vector<16x64xf32>
    %cst = arith.constant 0.000000e+00 : f32
    %6 = vector.broadcast %cst : f32 to vector<16x64xf32>
    %7 = arith.select %4, %6, %5 : vector<16x64xi1>, vector<16x64xf32>
    %c15_i32 = arith.constant 15 : i32
    %8 = vector.broadcast %c15_i32 : i32 to vector<16x64xi32>
    %9 = arith.cmpi eq, %2, %8 : vector<16x64xi32>
    %c15_i32_2 = arith.constant 15 : i32
    %10 = tpu.dynamic_rotate %1 by %c15_i32_2 dim 0 : vector<16x64xf32>, i32 -> vector<16x64xf32>
    %cst_3 = arith.constant 0.000000e+00 : f32
    %11 = vector.broadcast %cst_3 : f32 to vector<16x64xf32>
    %12 = arith.select %9, %11, %10 : vector<16x64xi1>, vector<16x64xf32>
    %13 = tpu.concatenate %7, %1, %12 in 1 : vector<16x64xf32>, vector<16x64xf32>, vector<16x64xf32> -> vector<16x192xf32>
    %14 = arith.truncf %13 : vector<16x192xf32> to vector<16x192xbf16>
    %c0_4 = arith.constant 0 : index
    %c0_5 = arith.constant 0 : index
    %15 = vector.load %arg3[%c0_4, %c0_5] : memref<1x512xf32, #tpu.memory_space<vmem>>, vector<1x512xf32>
    %c0_6 = arith.constant 0 : index
    %c0_7 = arith.constant 0 : index
    %16 = vector.load %arg2[%c0_6, %c0_7] : memref<192x512xbf16, #tpu.memory_space<vmem>>, vector<192x512xbf16>
    %cst_8 = arith.constant dense<0.000000e+00> : vector<16x512xf32>
    %17 = tpu.matmul %14, %16, %cst_8 {dimension_numbers = #tpu.dot_dimension_numbers<[1], [0], [0], [1], [0, 0, 1, 1], [], []>} : vector<16x192xbf16>, vector<192x512xbf16>, vector<16x512xf32> -> vector<16x512xf32>
    %18 = vector.broadcast %15 : vector<1x512xf32> to vector<16x512xf32>
    %19 = arith.addf %18, %17 : vector<16x512xf32>
    %20 = vector.extract_strided_slice %19 {offsets = [0, 0], sizes = [16, 256], strides = [1, 1]} : vector<16x512xf32> to vector<16x256xf32>
    %21 = vector.extract_strided_slice %19 {offsets = [0, 256], sizes = [16, 256], strides = [1, 1]} : vector<16x512xf32> to vector<16x256xf32>
    %cst_9 = arith.constant 0.000000e+00 : f32
    %22 = vector.broadcast %cst_9 : f32 to vector<16x256xf32>
    %23 = arith.cmpf oge, %20, %22 : vector<16x256xf32>
    %cst_10 = arith.constant 0.00999999977 : f32
    %24 = vector.broadcast %cst_10 : f32 to vector<16x256xf32>
    %25 = arith.mulf %24, %20 : vector<16x256xf32>
    %26 = arith.select %23, %20, %25 : vector<16x256xi1>, vector<16x256xf32>
    %27 = tpu.iota {dimensions = array<i32: 0>} : vector<16x256xi32>
    %c0_i32_11 = arith.constant 0 : i32
    %28 = vector.broadcast %c0_i32_11 : i32 to vector<16x256xi32>
    %29 = arith.cmpi eq, %27, %28 : vector<16x256xi32>
    %c1_i32_12 = arith.constant 1 : i32
    %30 = tpu.dynamic_rotate %26 by %c1_i32_12 dim 0 : vector<16x256xf32>, i32 -> vector<16x256xf32>
    %cst_13 = arith.constant 0.000000e+00 : f32
    %31 = vector.broadcast %cst_13 : f32 to vector<16x256xf32>
    %32 = arith.select %29, %31, %30 : vector<16x256xi1>, vector<16x256xf32>
    %c15_i32_14 = arith.constant 15 : i32
    %33 = vector.broadcast %c15_i32_14 : i32 to vector<16x256xi32>
    %34 = arith.cmpi eq, %27, %33 : vector<16x256xi32>
    %c15_i32_15 = arith.constant 15 : i32
    %35 = tpu.dynamic_rotate %26 by %c15_i32_15 dim 0 : vector<16x256xf32>, i32 -> vector<16x256xf32>
    %cst_16 = arith.constant 0.000000e+00 : f32
    %36 = vector.broadcast %cst_16 : f32 to vector<16x256xf32>
    %37 = arith.select %34, %36, %35 : vector<16x256xi1>, vector<16x256xf32>
    %38 = vector.extract_strided_slice %32 {offsets = [0, 128], sizes = [16, 128], strides = [1, 1]} : vector<16x256xf32> to vector<16x128xf32>
    %39 = vector.extract_strided_slice %37 {offsets = [0, 0], sizes = [16, 128], strides = [1, 1]} : vector<16x256xf32> to vector<16x128xf32>
    %40 = tpu.concatenate %26, %38, %39 in 1 : vector<16x256xf32>, vector<16x128xf32>, vector<16x128xf32> -> vector<16x512xf32>
    %41 = arith.truncf %40 : vector<16x512xf32> to vector<16x512xbf16>
    %c0_17 = arith.constant 0 : index
    %c0_18 = arith.constant 0 : index
    %42 = vector.load %arg5[%c0_17, %c0_18] : memref<1x256xf32, #tpu.memory_space<vmem>>, vector<1x256xf32>
    %c0_19 = arith.constant 0 : index
    %c0_20 = arith.constant 0 : index
    %43 = vector.load %arg4[%c0_19, %c0_20] : memref<512x256xbf16, #tpu.memory_space<vmem>>, vector<512x256xbf16>
    %cst_21 = arith.constant dense<0.000000e+00> : vector<16x256xf32>
    %44 = tpu.matmul %41, %43, %cst_21 {dimension_numbers = #tpu.dot_dimension_numbers<[1], [0], [0], [1], [0, 0, 1, 1], [], []>} : vector<16x512xbf16>, vector<512x256xbf16>, vector<16x256xf32> -> vector<16x256xf32>
    %45 = vector.broadcast %42 : vector<1x256xf32> to vector<16x256xf32>
    %46 = arith.addf %45, %44 : vector<16x256xf32>
    %47 = arith.mulf %46, %46 : vector<16x256xf32>
    %48 = arith.truncf %47 : vector<16x256xf32> to vector<16x256xbf16>
    %c0_22 = arith.constant 0 : index
    %c0_23 = arith.constant 0 : index
    %49 = vector.load %arg6[%c0_22, %c0_23] : memref<256x256xbf16, #tpu.memory_space<vmem>>, vector<256x256xbf16>
    %cst_24 = arith.constant dense<0.000000e+00> : vector<16x256xf32>
    %50 = tpu.matmul %48, %49, %cst_24 {dimension_numbers = #tpu.dot_dimension_numbers<[1], [0], [0], [1], [0, 0, 1, 1], [], []>} : vector<16x256xbf16>, vector<256x256xbf16>, vector<16x256xf32> -> vector<16x256xf32>
    %c0_25 = arith.constant 0 : index
    %c0_26 = arith.constant 0 : index
    %51 = vector.load %arg7[%c0_25, %c0_26] : memref<1x256xf32, #tpu.memory_space<vmem>>, vector<1x256xf32>
    %52 = vector.broadcast %51 : vector<1x256xf32> to vector<16x256xf32>
    %53 = arith.addf %50, %52 : vector<16x256xf32>
    %54 = math.sqrt %53 : vector<16x256xf32>
    %55 = arith.mulf %46, %54 : vector<16x256xf32>
    %56 = arith.addf %55, %21 : vector<16x256xf32>
    %c0_27 = arith.constant 0 : index
    %c0_28 = arith.constant 0 : index
    %c0_29 = arith.constant 0 : index
    %57 = vector.load %arg8[%c0_27, %c0_28, %c0_29] : memref<1x16x256xf32, #tpu.memory_space<vmem>>, vector<1x16x256xf32>
    %58 = vector.shape_cast %57 : vector<1x16x256xf32> to vector<16x256xf32>
    %59 = vector.shape_cast %56 : vector<16x256xf32> to vector<1x16x256xf32>
    tpu.vector_store %arg8[%c0_27, %c0_28, %c0_29], %59 {strides = array<i32>} : memref<1x16x256xf32, #tpu.memory_space<vmem>>, vector<1x16x256xf32>,
    return
  }
  func.func @transform_0(%arg0: i32) -> (i32, i32, i32) {
    %c0_i32 = arith.constant 0 : i32
    %c0_i32_0 = arith.constant 0 : i32
    %c0_i32_1 = arith.constant 0 : i32
    return %arg0, %c0_i32, %c0_i32_0 : i32, i32, i32
  }
  func.func @transform_1(%arg0: i32) -> (i32, i32) {
    %c0_i32 = arith.constant 0 : i32
    %c0_i32_0 = arith.constant 0 : i32
    %c0_i32_1 = arith.constant 0 : i32
    return %c0_i32, %c0_i32_0 : i32, i32
  }
  func.func @transform_2(%arg0: i32) -> (i32, i32) {
    %c0_i32 = arith.constant 0 : i32
    %c0_i32_0 = arith.constant 0 : i32
    %c0_i32_1 = arith.constant 0 : i32
    return %c0_i32, %c0_i32_0 : i32, i32
  }
  func.func @transform_3(%arg0: i32) -> (i32, i32) {
    %c0_i32 = arith.constant 0 : i32
    %c0_i32_0 = arith.constant 0 : i32
    %c0_i32_1 = arith.constant 0 : i32
    return %c0_i32, %c0_i32_0 : i32, i32
  }
  func.func @transform_4(%arg0: i32) -> (i32, i32) {
    %c0_i32 = arith.constant 0 : i32
    %c0_i32_0 = arith.constant 0 : i32
    %c0_i32_1 = arith.constant 0 : i32
    return %c0_i32, %c0_i32_0 : i32, i32
  }
  func.func @transform_5(%arg0: i32) -> (i32, i32) {
    %c0_i32 = arith.constant 0 : i32
    %c0_i32_0 = arith.constant 0 : i32
    %c0_i32_1 = arith.constant 0 : i32
    return %c0_i32, %c0_i32_0 : i32, i32
  }
  func.func @transform_6(%arg0: i32) -> (i32, i32) {
    %c0_i32 = arith.constant 0 : i32
    %c0_i32_0 = arith.constant 0 : i32
    %c0_i32_1 = arith.constant 0 : i32
    return %c0_i32, %c0_i32_0 : i32, i32
  }
  func.func @transform_7(%arg0: i32) -> (i32, i32, i32) {
    %c0_i32 = arith.constant 0 : i32
    %c0_i32_0 = arith.constant 0 : i32
    %c0_i32_1 = arith.constant 0 : i32
    return %arg0, %c0_i32, %c0_i32_0 : i32, i32, i32
  }
}

</mosaic_0001>

<bundles_post_ra>
// kernel: residual_block_upsample.1
= control target key start
LH: loop header
LB: loop body
LE: loop exit
PB: predicated region body
PF: predicated region fallthrough
CT: control target
= control target key end

     0   :  { %12 = vsyncpa [#allocation3], 0  ;;  %s2491_s0 = inlined_call_operand.vmem [shape: f32[2,16,64], index: 0, kind: input, shape index: {}]   ;;  %s2492_s1 = inlined_call_operand.vmem [shape: bf16[192,512], index: 1, kind: input, shape index: {}]   ;;  %s2493_s2 = inlined_call_operand.vmem [shape: f32[1,512], index: 2, kind: input, shape index: {}]   ;;  %s2494_s3 = inlined_call_operand.hbm [shape: bf16[512,256], index: 3, kind: input, shape index: {}]   ;;  %s2495_s4 = inlined_call_operand.vmem [shape: f32[1,256], index: 4, kind: input, shape index: {}]   ;;  %s2496_s5 = inlined_call_operand.hbm [shape: bf16[256,256], index: 5, kind: input, shape index: {}]   ;;  %s2497_s6 = inlined_call_operand.vmem [shape: f32[1,256], index: 6, kind: input, shape index: {}]   ;;  %s2498_s7 = inlined_call_operand.vmem [shape: f32[2,16,256], index: 7, kind: output, shape index: {}]  }
   0x1   :  { %13 = vsyncpa [#allocation5], 0  ;;  %s2184_s24 = smov 0  }
   0x2 LB: > { %s2190_s25 = sadd.s32 4294967295, %s2136_s24   ;;  %p1639_p0 = scmp.ge.s32.totalorder %s2136_s24, 1  ;;  %s2136_s24 = sphi %s2184_s24, %s19_s24  }
   0x3   : > { %p202_p1 = scmp.lt.s32.totalorder %s2136_s24, 3  ;;  %s2138_s26 = smov [#allocation2]  }
   0x4   : > { %s220_s27 = sshll.u32 %s2138_s26, 4  ;;  %p1823_p3 = scmp.eq.s32.totalorder %s2190_s25, 0  ;;  %s221_s27 = int_to_ptr.vmem [resolvable:$true] %s220_s27 }
   0x5   : > { %p2194_p2 = pnand %p1639_p0, %p202_p1  ;;  %s2139_s29 = smov [#allocation4]  }
   0x6   : > { %s236_s30 = sshll.u32 %s2139_s29, 4  ;;  %s2081_s9 = scalar_lea.vmem %s221_s27, 8192  ;;  %s237_s30 = int_to_ptr.vmem [resolvable:$true] %s236_s30 }
   0x7   : > { %p1816_p4 = pneg %p2194_p2  ;;  %p2082_p7 = scmp.ne.s32.totalorder %s221_s27, %s2081_s9 }
   0x8   : > { %p2089_p10 = scmp.lt.s32.totalorder %s221_s27, %s221_s27  ;;  %p2090_p11 = scmp.lt.s32.totalorder %s2081_s9, %s2081_s9 }
   0x9   : > { %p2203_p5 = pnand %p1823_p3, %p1816_p4 }
   0xa   : > { %p2091_p12 = por %p2090_p11, %p2089_p10 }
   0xb   : > { %p2072_p6 = pneg %p2203_p5 }
   0xd   : > { %p2084_p8 = pnand %p2082_p7, %p2072_p6 }
   0xf   : > { %p2085_p9 = pneg %p2084_p8 }
  0x11   : > { %p2092_p13 = pnand %p2091_p12, %p2085_p9 }
  0x13   : > { %2095 = shalt.err (!%p2092_p13)
}
  0x14   : > { %s2140_s10 = smov 128   ;;  %s2141_s11 = smov 8  }
  0x15   : > { %1819 = dma.hbm_to_vmem [thread:$0]  (!%p2203_p5), %s2494_s3, 8192, %s221_s27, [#allocation3], %s2140_s10, %s2140_s10, %s2141_s11  }
  0x16   : > { %s2107_s14 = scalar_lea.vmem %s237_s30, 4096  ;;  %p2115_p7 = scmp.lt.s32.totalorder %s237_s30, %s237_s30 }
  0x17   : > { %p2108_p0 = scmp.ne.s32.totalorder %s237_s30, %s2107_s14  ;;  %p2116_p8 = scmp.lt.s32.totalorder %s2107_s14, %s2107_s14 }
  0x19   : > { %p2110_p1 = pnand %p2108_p0, %p2072_p6  ;;  %p2117_p10 = por %p2116_p8, %p2115_p7 }
  0x1b   : > { %p2111_p4 = pneg %p2110_p1 }
  0x1d   : > { %p2118_p9 = pnand %p2117_p10, %p2111_p4 }
  0x1f   : > { %2121 = shalt.err (!%p2118_p9)
}
  0x20   : > { %1822 = dma.hbm_to_vmem [thread:$0]  (!%p2203_p5), %s2496_s5, 4096, %s237_s30, [#allocation5], %s2140_s10, %s2140_s10, %s2141_s11  }
  0x21   : > { %263 = sbr.rel (%p2194_p2) target bundleno = 810 (0x32a), region = 48 }
  0x26   : > { %2127 = dma.done.wait (%p1823_p3), [#allocation3], 8192  }
  0x27   : > { %2129 = vsyncadd (%p1823_p3), [#allocation3], 4294959104 }
  0x28   : > { %2131 = dma.done.wait (%p1823_p3), [#allocation5], 4096  }
  0x29   : > { %2133 = vsyncadd (%p1823_p3), [#allocation5], 4294963200  ;;  %p299_p6 = scmp.lt.s32.totalorder %s2190_s25, 1  ;;  %v312_v0 = vlaneseq  ;;  %v1846_v9 = vld [vmem:[%s2492_s1 + $0xe4] ss:$16 sps:$4 sm:$0xff]   ;;  %s2142_s27 = smov 64  }
  0x2a   : > { %v1848_v11 = vld [vmem:[%s2492_s1 + $0xe0] ss:$16 sps:$4 sm:$0xff]   ;;  %638 = vmatprep.subr.bf16.mxu1 %v1846_v9  ;;  %v1849_v12 = vld [vmem:[%s2492_s1 + $0xc4] ss:$16 sps:$4 sm:$0xff]   ;;  %vm341_vm3 = vcmask 523264   ;;  %vm2143_vm11 = vmmov 1  }
  0x2b   : > { %s2502_s25 = smov (!%p299_p6, %s2190_s25), 1  ;;  %v2239_v1 = vshrl.u32 %v312_v0, 7  ;;  %639 = vmatpush1.bf16.msra.mxu1 %v1848_v11  ;;  %v1851_v15 = vld [vmem:[%s2492_s1 + $0xc0] ss:$16 sps:$4 sm:$0xff]   ;;  %v1852_v18 = vld [vmem:[%s2492_s1 + $0xa4] ss:$16 sps:$4 sm:$0xff]  }
  0x2c   : > { %s1806_s17 = sshll.u32 %s2502_s25, 4  ;;  %640 = vmatprep.subr.bf16.mxu1 %v1849_v12  ;;  %v1854_v21 = vld [vmem:[%s2492_s1 + $0xa0] ss:$16 sps:$4 sm:$0xff]   ;;  %v1855_v22 = vld [vmem:[%s2492_s1 + $0x84] ss:$16 sps:$4 sm:$0xff]   ;;  %s1807_s19 = sshll.u32 %s2502_s25, 5 }
  0x2d   : > { %s303_s20 = scalar_lea.vmem %s2491_s0, %s1806_s17  ;;  %v2246_v2 = vadd.s32 8, %v2239_v1  ;;  %vm328_vm0 = vcmp.lt.s32.totalorder %v2239_v1, 7  ;;  %vm319_vm1 = vcmp.lt.s32.totalorder %v2239_v1, 1  ;;  %v1857_v23 = vld [vmem:[%s2492_s1 + $0x80] ss:$16 sps:$4 sm:$0xff]   ;;  %vm315_vm4 = vcmp.eq.s32.totalorder %v2239_v1, 0  ;;  %s308_s22 = scalar_lea.vmem %s2498_s7, %s1807_s19 }
  0x2e   : > { %v310_v3 = vld [vmem:[%s303_s20] sm:$0xff]  ;;  %v311_v4 = vld [vmem:[%s303_s20 + $0x8] sm:$0xff]  ;;  %v1918_v39 = vld [vmem:[#allocation2 + $0x74] ss:$8 sps:$4 sm:$0xff]  }
  0x2f   : > { %v318_v5 = vrot.slane %v311_v4, 7  ;;  %v327_v6 = vrot.slane %v311_v4, 1  ;;  %v1841_v7 = vpack.i.bf16 %v311_v4, %v310_v3  ;;  %v317_v8 = vrot.slane %v310_v3, 7  ;;  %641 = vmatpush1.bf16.msra.mxu1 %v1851_v15  ;;  %v1858_v24 = vld [vmem:[%s2492_s1 + $0x64] ss:$16 sps:$4 sm:$0xff]   ;;  %1166 = vmatprep.subr.bf16.mxu0 %v1918_v39  ;;  %vm1768_vm10 = vmneg %vm315_vm4 }
  0x30   : > { %v326_v10 = vrot.slane %v310_v3, 1  ;;  %vm325_vm2 = vcmp.eq.s32.totalorder %v2246_v2, 15  ;;  %642 = vmatprep.subr.bf16.mxu1 %v1852_v18  ;;  %v1860_v25 = vld [vmem:[%s2492_s1 + $0x60] ss:$16 sps:$4 sm:$0xff]   ;;  %v1861_v26 = vld [vmem:[%s2492_s1 + $0x44] ss:$16 sps:$4 sm:$0xff]   ;;  %vm1769_vm13 = vmpackc.low %vm2143_vm11, %vm1768_vm10 }
  0x31   : > { %1842 = vrot.lane.b32.xlu0 %v1841_v7, %s2142_s27  ;;  %v2262_v13 = vsel %vm319_vm1, %v317_v8, %v318_v5  ;;  %v2266_v14 = vsel %vm319_vm1, %v318_v5, %v317_v8  ;;  %v1863_v27 = vld [vmem:[%s2492_s1 + $0x40] ss:$16 sps:$4 sm:$0xff]   ;;  %v1864_v28 = vld [vmem:[%s2492_s1 + $0x24] ss:$16 sps:$4 sm:$0xff]   ;;  %v1884_v43 = vld [vmem:[%s2492_s1 + $0xec] ss:$16 sps:$4 sm:$0xff]  }
  0x32   : > { %v329_v16 = vsel %vm328_vm0, %v326_v10, %v327_v6  ;;  %v330_v17 = vsel %vm328_vm0, %v327_v6, %v326_v10  ;;  %v1866_v29 = vld [vmem:[%s2492_s1 + $0x20] ss:$16 sps:$4 sm:$0xff]   ;;  %v1867_v30 = vld [vmem:[%s2492_s1 + $0x4] ss:$16 sps:$4 sm:$0xff]   ;;  %v322_v5 = vsel %vm315_vm4, 0.0, %v2266_v14  ;;  %vm1764_vm9 = vmneg %vm325_vm2 }
  0x33   : > { %v332_v19 = vsel %vm325_vm2, 0.0, %v330_v17  ;;  %643 = vmatpush1.bf16.msra.mxu1 %v1854_v21  ;;  %v1869_v31 = vld [vmem:[%s2492_s1] ss:$16 sps:$4 sm:$0xff]   ;;  %v1870_v32 = vld [vmem:[%s2492_s1 + $0x164] ss:$16 sps:$4 sm:$0xff]   ;;  %vm1765_vm12 = vmpackc.low %vm1764_vm9, %vm2143_vm11 }
  0x34   : > { %v2280_v20 = vpack.c.bf16 %v332_v19, %v329_v16  ;;  %644 = vmatprep.subr.bf16.mxu1 %v1855_v22  ;;  %v1872_v33 = vld [vmem:[%s2492_s1 + $0x160] ss:$16 sps:$4 sm:$0xff]   ;;  %v1873_v34 = vld [vmem:[%s2492_s1 + $0x144] ss:$16 sps:$4 sm:$0xff]   ;;  %v1882_v8 = vld [vmem:[%s2492_s1 + $0xe8] ss:$16 sps:$4 sm:$0xff]  }
  0x35   : > { %v1875_v35 = vld [vmem:[%s2492_s1 + $0x140] ss:$16 sps:$4 sm:$0xff]   ;;  %v1876_v36 = vld [vmem:[%s2492_s1 + $0x124] ss:$16 sps:$4 sm:$0xff]   ;;  %v1887_v12 = vld [vmem:[%s2492_s1 + $0xcc] ss:$16 sps:$4 sm:$0xff]  }
  0x36   : > { %1698 = vmatprep.mubr.msk.bf16.mxu1 %vm341_vm3, %v2280_v20  ;;  %v1878_v37 = vld [vmem:[%s2492_s1 + $0x120] ss:$16 sps:$4 sm:$0xff]   ;;  %v1879_v38 = vld [vmem:[%s2492_s1 + $0x104] ss:$16 sps:$4 sm:$0xff]   ;;  %v1885_v14 = vld [vmem:[%s2492_s1 + $0xc8] ss:$16 sps:$4 sm:$0xff]  }
  0x37   : > { %645 = vmatpush1.bf16.msra.mxu1 %v1857_v23  ;;  %v1920_v40 = vld [vmem:[#allocation2 + $0x70] ss:$8 sps:$4 sm:$0xff]   ;;  %v1924_v42 = vld [vmem:[#allocation2 + $0x64] ss:$8 sps:$4 sm:$0xff]   ;;  %v1926_v44 = vld [vmem:[#allocation2 + $0x60] ss:$8 sps:$4 sm:$0xff]  }
  0x38   : > { %646 = vmatprep.subr.bf16.mxu1 %v1858_v24  ;;  %v1881_v41 = vld [vmem:[%s2492_s1 + $0x100] ss:$16 sps:$4 sm:$0xff]   ;;  %1167 = vmatpush1.bf16.msra.mxu0 %v1920_v40  ;;  %v1930_v45 = vld [vmem:[#allocation2 + $0x54] ss:$8 sps:$4 sm:$0xff]   ;;  %v1936_v47 = vld [vmem:[#allocation2 + $0x44] ss:$8 sps:$4 sm:$0xff]  }
  0x39   : > { %1168 = vmatprep.subr.bf16.mxu0 %v1924_v42  ;;  %v1932_v46 = vld [vmem:[#allocation2 + $0x50] ss:$8 sps:$4 sm:$0xff]   ;;  %v1938_v48 = vld [vmem:[#allocation2 + $0x40] ss:$8 sps:$4 sm:$0xff]   ;;  %v1942_v49 = vld [vmem:[#allocation2 + $0x34] ss:$8 sps:$4 sm:$0xff]  }
  0x3a   : > { %v1944_v50 = vld [vmem:[#allocation2 + $0x30] ss:$8 sps:$4 sm:$0xff]   ;;  %v1948_v51 = vld [vmem:[#allocation2 + $0x24] ss:$8 sps:$4 sm:$0xff]   ;;  %v1950_v52 = vld [vmem:[#allocation2 + $0x20] ss:$8 sps:$4 sm:$0xff]  }
  0x3b   : > { %647 = vmatpush1.bf16.msra.mxu1 %v1860_v25  ;;  %v1954_v53 = vld [vmem:[#allocation2 + $0x14] ss:$8 sps:$4 sm:$0xff]   ;;  %v1956_v54 = vld [vmem:[#allocation2 + $0x10] ss:$8 sps:$4 sm:$0xff]   ;;  %v1960_v55 = vld [vmem:[#allocation2 + $0x4] ss:$8 sps:$4 sm:$0xff]  }
  0x3c   : > { %648 = vmatprep.subr.bf16.mxu1 %v1861_v26  ;;  %1169 = vmatpush1.bf16.msra.mxu0 %v1926_v44  ;;  %v1962_v56 = vld [vmem:[#allocation2] ss:$8 sps:$4 sm:$0xff]   ;;  %v1966_v57 = vld [vmem:[#allocation2 + $0xf4] ss:$8 sps:$4 sm:$0xff]   ;;  %v1968_v58 = vld [vmem:[#allocation2 + $0xf0] ss:$8 sps:$4 sm:$0xff]  }
  0x3d   : > { %1170 = vmatprep.subr.bf16.mxu0 %v1930_v45  ;;  %v1972_v59 = vld [vmem:[#allocation2 + $0xe4] ss:$8 sps:$4 sm:$0xff]   ;;  %v1974_v60 = vld [vmem:[#allocation2 + $0xe0] ss:$8 sps:$4 sm:$0xff]   ;;  %v1978_v61 = vld [vmem:[#allocation2 + $0xd4] ss:$8 sps:$4 sm:$0xff]  }
  0x3e   : > { %v1980_v62 = vld [vmem:[#allocation2 + $0xd0] ss:$8 sps:$4 sm:$0xff]   ;;  %v1984_v63 = vld [vmem:[#allocation2 + $0xc4] ss:$8 sps:$4 sm:$0xff]   ;;  %v1986_v0 = vld [vmem:[#allocation2 + $0xc0] ss:$8 sps:$4 sm:$0xff]  }
  0x3f   : > { %649 = vmatpush1.bf16.msra.mxu1 %v1863_v27  ;;  %v1990_v3 = vld [vmem:[#allocation2 + $0xb4] ss:$8 sps:$4 sm:$0xff]   ;;  %v1891_v17 = vld [vmem:[%s2492_s1 + $0x88] ss:$16 sps:$4 sm:$0xff]   ;;  %v1941_v40 = vld [vmem:[#allocation2 + $0x144] ss:$8 sps:$4 sm:$0xff]  }
  0x40   : > { %650 = vmatprep.subr.bf16.mxu1 %v1864_v28  ;;  %1171 = vmatpush1.bf16.msra.mxu0 %v1932_v46  ;;  %v1890_v15 = vld [vmem:[%s2492_s1 + $0xac] ss:$16 sps:$4 sm:$0xff]   ;;  %v1894_v19 = vld [vmem:[%s2492_s1 + $0x68] ss:$16 sps:$4 sm:$0xff]  }
  0x41   : > { %1172 = vmatprep.subr.bf16.mxu0 %v1936_v47  ;;  %v1893_v16 = vld [vmem:[%s2492_s1 + $0x8c] ss:$16 sps:$4 sm:$0xff]   ;;  %v1897_v21 = vld [vmem:[%s2492_s1 + $0x48] ss:$16 sps:$4 sm:$0xff]  }
  0x42   : > { %v1896_v18 = vld [vmem:[%s2492_s1 + $0x6c] ss:$16 sps:$4 sm:$0xff]   ;;  %v1900_v23 = vld [vmem:[%s2492_s1 + $0x28] ss:$16 sps:$4 sm:$0xff]  }
  0x43   : > { %651 = vmatpush1.bf16.msra.mxu1 %v1866_v29  ;;  %v1902_v22 = vld [vmem:[%s2492_s1 + $0x2c] ss:$16 sps:$4 sm:$0xff]   ;;  %v1903_v25 = vld [vmem:[%s2492_s1 + $0x8] ss:$16 sps:$4 sm:$0xff]  }
  0x44   : > { %652 = vmatprep.subr.bf16.mxu1 %v1867_v30  ;;  %1173 = vmatpush1.bf16.msra.mxu0 %v1938_v48  ;;  %v1905_v24 = vld [vmem:[%s2492_s1 + $0xc] ss:$16 sps:$4 sm:$0xff]   ;;  %v1906_v27 = vld [vmem:[%s2492_s1 + $0x168] ss:$16 sps:$4 sm:$0xff]  }
  0x45   : > { %1174 = vmatprep.subr.bf16.mxu0 %v1942_v49  ;;  %v1908_v26 = vld [vmem:[%s2492_s1 + $0x16c] ss:$16 sps:$4 sm:$0xff]   ;;  %v1909_v29 = vld [vmem:[%s2492_s1 + $0x148] ss:$16 sps:$4 sm:$0xff]  }
  0x46   : > { %v1911_v28 = vld [vmem:[%s2492_s1 + $0x14c] ss:$16 sps:$4 sm:$0xff]   ;;  %v1933_v39 = vld [vmem:[#allocation2 + $0x150] ss:$8 sps:$4 sm:$0xff]   ;;  %v1951_v46 = vld [vmem:[#allocation2 + $0x120] ss:$8 sps:$4 sm:$0xff]  }
  0x47   : > { %653 = vmatpush1.bf16.msra.mxu1 %v1869_v31  ;;  %v1914_v30 = vld [vmem:[%s2492_s1 + $0x12c] ss:$16 sps:$4 sm:$0xff]   ;;  %v1912_v31 = vld [vmem:[%s2492_s1 + $0x128] ss:$16 sps:$4 sm:$0xff]  }
  0x48   : > { %662 = vmatprep.subr.bf16.mxu1 %v1870_v32  ;;  %1175 = vmatpush1.bf16.msra.mxu0 %v1944_v50  ;;  %v1917_v32 = vld [vmem:[%s2492_s1 + $0x10c] ss:$16 sps:$4 sm:$0xff]   ;;  %v1992_v45 = vld [vmem:[#allocation2 + $0xb0] ss:$8 sps:$4 sm:$0xff]   ;;  %v1998_v49 = vld [vmem:[#allocation2 + $0xa0] ss:$8 sps:$4 sm:$0xff]  }
  0x49   : > { %1176 = vmatprep.subr.bf16.mxu0 %v1948_v51  ;;  %v1947_v42 = vld [vmem:[#allocation2 + $0x134] ss:$8 sps:$4 sm:$0xff]   ;;  %v1953_v44 = vld [vmem:[#allocation2 + $0x124] ss:$8 sps:$4 sm:$0xff]   ;;  %v1957_v50 = vld [vmem:[#allocation2 + $0x110] ss:$8 sps:$4 sm:$0xff]  }
  0x4a   : > { %v1959_v47 = vld [vmem:[#allocation2 + $0x114] ss:$8 sps:$4 sm:$0xff]   ;;  %v1996_v48 = vld [vmem:[#allocation2 + $0xa4] ss:$8 sps:$4 sm:$0xff]  }
  0x4b   : > { %663 = vmatpush2.bf16.msra.mxu1 %v1872_v33  ;;  %v1915_v33 = vld [vmem:[%s2492_s1 + $0x108] ss:$16 sps:$4 sm:$0xff]   ;;  %v1965_v51 = vld [vmem:[#allocation2 + $0x104] ss:$8 sps:$4 sm:$0xff]  }
  0x4c   : > { %664 = vmatprep.subr.bf16.mxu1 %v1873_v34  ;;  %1177 = vmatpush1.bf16.msra.mxu0 %v1950_v52  ;;  %v1923_v34 = vld [vmem:[#allocation2 + $0x174] ss:$8 sps:$4 sm:$0xff]  }
  0x4d   : > { %1178 = vmatprep.subr.bf16.mxu0 %v1954_v53  ;;  %v2002_v52 = vld [vmem:[#allocation2 + $0x94] ss:$8 sps:$4 sm:$0xff]   ;;  %v2004_v53 = vld [vmem:[#allocation2 + $0x90] ss:$8 sps:$4 sm:$0xff]  }
  0x4f   : > { %665 = vmatpush2.bf16.msra.mxu1 %v1875_v35  ;;  %v1921_v35 = vld [vmem:[#allocation2 + $0x170] ss:$8 sps:$4 sm:$0xff]  }
  0x50   : > { %666 = vmatprep.subr.bf16.mxu1 %v1876_v36  ;;  %1179 = vmatpush1.bf16.msra.mxu0 %v1956_v54  ;;  %v1929_v36 = vld [vmem:[#allocation2 + $0x164] ss:$8 sps:$4 sm:$0xff]   ;;  %v1963_v54 = vld [vmem:[#allocation2 + $0x100] ss:$8 sps:$4 sm:$0xff]  }
  0x51   : > { %1180 = vmatprep.subr.bf16.mxu0 %v1960_v55  ;;  %v2008_v55 = vld [vmem:[#allocation2 + $0x84] ss:$8 sps:$4 sm:$0xff]  }
  0x53   : > { %667 = vmatpush2.bf16.msra.mxu1 %v1878_v37  ;;  %v1927_v37 = vld [vmem:[#allocation2 + $0x160] ss:$8 sps:$4 sm:$0xff]  }
  0x54   : > { %668 = vmatprep.subr.bf16.mxu1 %v1879_v38  ;;  %1181 = vmatpush1.bf16.msra.mxu0 %v1962_v56  ;;  %v1935_v38 = vld [vmem:[#allocation2 + $0x154] ss:$8 sps:$4 sm:$0xff]   ;;  %v2010_v56 = vld [vmem:[#allocation2 + $0x80] ss:$8 sps:$4 sm:$0xff]  }
  0x55   : > { %1182 = vmatprep.subr.bf16.mxu0 %v1966_v57  ;;  %v1971_v57 = vld [vmem:[#allocation2 + $0x1f4] ss:$8 sps:$4 sm:$0xff]  }
  0x57   : > { %669 = vmatpush2.bf16.msra.mxu1 %v1881_v41  ;;  %v1939_v41 = vld [vmem:[#allocation2 + $0x140] ss:$8 sps:$4 sm:$0xff]  }
  0x58   : > { %681 = vmatprep.subr.bf16.mxu1 %v1884_v43  ;;  %1183 = vmatpush2.bf16.msra.mxu0 %v1968_v58  ;;  %v1945_v43 = vld [vmem:[#allocation2 + $0x130] ss:$8 sps:$4 sm:$0xff]  }
  0x59   : > { %1184 = vmatprep.subr.bf16.mxu0 %v1972_v59  ;;  %v1969_v58 = vld [vmem:[#allocation2 + $0x1f0] ss:$8 sps:$4 sm:$0xff]   ;;  %v1977_v59 = vld [vmem:[#allocation2 + $0x1e4] ss:$8 sps:$4 sm:$0xff]  }
  0x5c   : > { %1185 = vmatpush2.bf16.msra.mxu0 %v1974_v60  ;;  %v1975_v60 = vld [vmem:[#allocation2 + $0x1e0] ss:$8 sps:$4 sm:$0xff]  }
  0x5d   : > { %1186 = vmatprep.subr.bf16.mxu0 %v1978_v61  ;;  %v1983_v61 = vld [vmem:[#allocation2 + $0x1d4] ss:$8 sps:$4 sm:$0xff]  }
  0x60   : > { %1187 = vmatpush2.bf16.msra.mxu0 %v1980_v62  ;;  %v1981_v62 = vld [vmem:[#allocation2 + $0x1d0] ss:$8 sps:$4 sm:$0xff]  }
  0x61   : > { %1188 = vmatprep.subr.bf16.mxu0 %v1984_v63  ;;  %v1989_v63 = vld [vmem:[#allocation2 + $0x1c4] ss:$8 sps:$4 sm:$0xff]  }
  0x64   : > { %1189 = vmatpush2.bf16.msra.mxu0 %v1986_v0  ;;  %v1987_v0 = vld [vmem:[#allocation2 + $0x1c0] ss:$8 sps:$4 sm:$0xff]  }
  0x65   : > { %1190 = vmatprep.subr.bf16.mxu0 %v1990_v3  ;;  %v1995_v3 = vld [vmem:[#allocation2 + $0x1b4] ss:$8 sps:$4 sm:$0xff]  }
  0x68   : > { %1191 = vmatpush2.bf16.msra.mxu0 %v1992_v45 }
  0x69   : > { %1192 = vmatprep.subr.bf16.mxu0 %v1996_v48  ;;  %v2020_v48 = vld [vmem:[#allocation4 + $0x50] ss:$8 sps:$4 sm:$0xff]  }
  0x6c   : > { %1193 = vmatpush2.bf16.msra.mxu0 %v1998_v49  ;;  %v2025_v49 = vld [vmem:[#allocation4 + $0x44] ss:$8 sps:$4 sm:$0xff]  }
  0x6d   : > { %1194 = vmatprep.subr.bf16.mxu0 %v2002_v52  ;;  %v2026_v52 = vld [vmem:[#allocation4 + $0x30] ss:$8 sps:$4 sm:$0xff]  }
  0x70   : > { %1195 = vmatpush2.bf16.msra.mxu0 %v2004_v53  ;;  %v2031_v53 = vld [vmem:[#allocation4 + $0x24] ss:$8 sps:$4 sm:$0xff]  }
  0x71   : > { %1196 = vmatprep.subr.bf16.mxu0 %v2008_v55  ;;  %v2034_v55 = vld [vmem:[#allocation4 + $0x14] ss:$8 sps:$4 sm:$0xff]  }
  0x74   : > { %1197 = vmatpush2.bf16.msra.mxu0 %v2010_v56  ;;  %v2032_v56 = vld [vmem:[#allocation4 + $0x10] ss:$8 sps:$4 sm:$0xff]  }
  0xa3   : > { %v1843_v4 = vpop.permute.xlu0 %1842 }
  0xa4   : > { %v1845_v6 = vunpack.i.h.bf16 %v1843_v4  ;;  %v1844_v7 = vunpack.i.l.bf16 %v1843_v4  ;;  %v1993_v4 = vld [vmem:[#allocation2 + $0x1b0] ss:$8 sps:$4 sm:$0xff]  }
  0xa6   : > { %v342_v9 = vsel %vm341_vm3, %v322_v5, %v1844_v7  ;;  %v343_v10 = vsel %vm341_vm3, %v2262_v13, %v1845_v6  ;;  %v1888_v13 = vld [vmem:[%s2492_s1 + $0xa8] ss:$16 sps:$4 sm:$0xff]   ;;  %v2001_v5 = vld [vmem:[#allocation2 + $0x1a4] ss:$8 sps:$4 sm:$0xff]   ;;  %v2007_v7 = vld [vmem:[#allocation2 + $0x194] ss:$8 sps:$4 sm:$0xff]  }
  0xa7   : > { %v344_v11 = vpack.c.bf16 %v343_v10, %v342_v9  ;;  %v1999_v6 = vld [vmem:[#allocation2 + $0x1a0] ss:$8 sps:$4 sm:$0xff]   ;;  %v2013_v9 = vld [vmem:[#allocation2 + $0x184] ss:$8 sps:$4 sm:$0xff]  }
  0xa8   : > { %v2011_v10 = vld [vmem:[#allocation2 + $0x180] ss:$8 sps:$4 sm:$0xff]  }
  0xa9   : > { %671 = vmatmul.mubr.bf16.vlgmr.msra.gmra.mxu1 %v344_v11 }
  0xaa   : > { %682 = vmatpush1.bf16.msra.mxu1 %v1882_v8  ;;  %1699 = vmatprep.mubr.msk.bf16.mxu1 %vm341_vm3, %v2280_v20  ;;  %v1899_v20 = vld [vmem:[%s2492_s1 + $0x4c] ss:$16 sps:$4 sm:$0xff]   ;;  %v2005_v8 = vld [vmem:[#allocation2 + $0x190] ss:$8 sps:$4 sm:$0xff]  }
  0xab   : > { %683 = vmatprep.subr.bf16.mxu1 %v1887_v12  ;;  %v2423_v12 = vsub.s32 0, %v2239_v1 }
  0xae   : > { %684 = vmatpush1.bf16.msra.mxu1 %v1885_v14  ;;  %v2428_v14 = vld [vmem:[%s2493_s2] sm:$0xf] }
  0xaf   : > { %685 = vmatprep.subr.bf16.mxu1 %v1890_v15  ;;  %v2431_v15 = vsub.s32 1, %v2239_v1 }
  0xb2   : > { %686 = vmatpush1.bf16.msra.mxu1 %v1888_v13  ;;  %v728_v13 = vrot.slane %v2428_v14, %v2423_v12 }
  0xb3   : > { %687 = vmatprep.subr.bf16.mxu1 %v1893_v16  ;;  %v732_v16 = vrot.slane %v2428_v14, %v2431_v15 }
  0xb6   : > { %688 = vmatpush1.bf16.msra.mxu1 %v1891_v17 }
  0xb7   : > { %689 = vmatprep.subr.bf16.mxu1 %v1896_v18 }
  0xba   : > { %690 = vmatpush1.bf16.msra.mxu1 %v1894_v19 }
  0xbb   : > { %691 = vmatprep.subr.bf16.mxu1 %v1899_v20 }
  0xbe   : > { %692 = vmatpush1.bf16.msra.mxu1 %v1897_v21 }
  0xbf   : > { %693 = vmatprep.subr.bf16.mxu1 %v1902_v22 }
  0xc2   : > { %694 = vmatpush1.bf16.msra.mxu1 %v1900_v23 }
  0xc3   : > { %695 = vmatprep.subr.bf16.mxu1 %v1905_v24 }
  0xc6   : > { %696 = vmatpush1.bf16.msra.mxu1 %v1903_v25 }
  0xc7   : > { %705 = vmatprep.subr.bf16.mxu1 %v1908_v26 }
  0xca   : > { %706 = vmatpush2.bf16.msra.mxu1 %v1906_v27 }
  0xcb   : > { %707 = vmatprep.subr.bf16.mxu1 %v1911_v28 }
  0xce   : > { %708 = vmatpush2.bf16.msra.mxu1 %v1909_v29 }
  0xcf   : > { %709 = vmatprep.subr.bf16.mxu1 %v1914_v30 }
  0xd2   : > { %710 = vmatpush2.bf16.msra.mxu1 %v1912_v31 }
  0xd3   : > { %711 = vmatprep.subr.bf16.mxu1 %v1917_v32 }
  0xd6   : > { %712 = vmatpush2.bf16.msra.mxu1 %v1915_v33 }
  0xd7   : > { %1209 = vmatprep.subr.bf16.mxu1 %v1923_v34 }
  0xd9   : > { %714 = vmatmul.mubr.bf16.vlgmr.msra.gmra.mxu1 %v344_v11  ;;  %v2016_v11 = vld [vmem:[#allocation4 + $0x74] ss:$8 sps:$4 sm:$0xff]  }
  0xda   : > { %1210 = vmatpush1.bf16.msra.mxu1 %v1921_v35  ;;  %1477 = vmatprep.subr.bf16.mxu0 %v2016_v11 }
  0xdb   : > { %1211 = vmatprep.subr.bf16.mxu1 %v1929_v36 }
  0xde   : > { %1212 = vmatpush1.bf16.msra.mxu1 %v1927_v37 }
  0xdf   : > { %1213 = vmatprep.subr.bf16.mxu1 %v1935_v38 }
  0xe2   : > { %1214 = vmatpush1.bf16.msra.mxu1 %v1933_v39 }
  0xe3   : > { %1215 = vmatprep.subr.bf16.mxu1 %v1941_v40  ;;  %v2014_v40 = vld [vmem:[#allocation4 + $0x70] ss:$8 sps:$4 sm:$0xff]  }
  0xe6   : > { %1216 = vmatpush1.bf16.msra.mxu1 %v1939_v41 }
  0xe7   : > { %1217 = vmatprep.subr.bf16.mxu1 %v1947_v42  ;;  %v2019_v42 = vld [vmem:[#allocation4 + $0x64] ss:$8 sps:$4 sm:$0xff]  }
  0xea   : > { %1218 = vmatpush1.bf16.msra.mxu1 %v1945_v43 }
  0xeb   : > { %1219 = vmatprep.subr.bf16.mxu1 %v1953_v44 }
  0xee   : > { %1220 = vmatpush1.bf16.msra.mxu1 %v1951_v46  ;;  %v2017_v46 = vld [vmem:[#allocation4 + $0x60] ss:$8 sps:$4 sm:$0xff]  }
  0xef   : > { %1221 = vmatprep.subr.bf16.mxu1 %v1959_v47  ;;  %v2022_v47 = vld [vmem:[#allocation4 + $0x54] ss:$8 sps:$4 sm:$0xff]  }
  0xf2   : > { %1222 = vmatpush1.bf16.msra.mxu1 %v1957_v50  ;;  %v2023_v50 = vld [vmem:[#allocation4 + $0x40] ss:$8 sps:$4 sm:$0xff]  }
  0xf3   : > { %1223 = vmatprep.subr.bf16.mxu1 %v1965_v51  ;;  %v2028_v51 = vld [vmem:[#allocation4 + $0x34] ss:$8 sps:$4 sm:$0xff]  }
  0xf6   : > { %1224 = vmatpush1.bf16.msra.mxu1 %v1963_v54  ;;  %v2029_v54 = vld [vmem:[#allocation4 + $0x20] ss:$8 sps:$4 sm:$0xff]  }
  0xf7   : > { %1225 = vmatprep.subr.bf16.mxu1 %v1971_v57  ;;  %v2037_v57 = vld [vmem:[#allocation4 + $0x4] ss:$8 sps:$4 sm:$0xff]  }
  0xfa   : > { %1226 = vmatpush2.bf16.msra.mxu1 %v1969_v58  ;;  %v2035_v58 = vld [vmem:[#allocation4] ss:$8 sps:$4 sm:$0xff]  }
  0xfb   : > { %1227 = vmatprep.subr.bf16.mxu1 %v1977_v59  ;;  %v735_v59 = vsub.s32 2, %v2239_v1 }
  0xfe   : > { %1228 = vmatpush2.bf16.msra.mxu1 %v1975_v60  ;;  %v2040_v60 = vld [vmem:[#allocation4 + $0xf4] ss:$8 sps:$4 sm:$0xff]  }
  0xff   : > { %1229 = vmatprep.subr.bf16.mxu1 %v1983_v61  ;;  %v739_v61 = vsub.s32 3, %v2239_v1 }
 0x102   : > { %1230 = vmatpush2.bf16.msra.mxu1 %v1981_v62  ;;  %v2038_v62 = vld [vmem:[#allocation4 + $0xf0] ss:$8 sps:$4 sm:$0xff]  }
 0x103   : > { %1231 = vmatprep.subr.bf16.mxu1 %v1989_v63  ;;  %v736_v63 = vrot.slane %v2428_v14, %v735_v59 }
 0x106   : > { %1232 = vmatpush2.bf16.msra.mxu1 %v1987_v0  ;;  %v2043_v0 = vld [vmem:[#allocation4 + $0xe4] ss:$8 sps:$4 sm:$0xff]  }
 0x107   : > { %1233 = vmatprep.subr.bf16.mxu1 %v1995_v3  ;;  %v2453_v3 = vrot.slane %v2428_v14, %v739_v61  ;;  %v2047_v14 = vld [vmem:[#allocation4 + $0xc0] ss:$8 sps:$4 sm:$0xff]  }
 0x10a   : > { %1234 = vmatpush2.bf16.msra.mxu1 %v1993_v4 }
 0x10b   : > { %1235 = vmatprep.subr.bf16.mxu1 %v2001_v5  ;;  %v2041_v5 = vld [vmem:[#allocation4 + $0xe0] ss:$8 sps:$4 sm:$0xff]  }
 0x10e   : > { %1236 = vmatpush2.bf16.msra.mxu1 %v1999_v6 }
 0x10f   : > { %1237 = vmatprep.subr.bf16.mxu1 %v2007_v7  ;;  %v2046_v7 = vld [vmem:[#allocation4 + $0xd4] ss:$8 sps:$4 sm:$0xff]  }
 0x112   : > { %1238 = vmatpush2.bf16.msra.mxu1 %v2005_v8 }
 0x113   : > { %1239 = vmatprep.subr.bf16.mxu1 %v2013_v9 }
 0x116   : > { %1240 = vmatpush2.bf16.msra.mxu1 %v2011_v10  ;;  %v2044_v10 = vld [vmem:[#allocation4 + $0xd0] ss:$8 sps:$4 sm:$0xff]  }
 0x169   : > { %v672_v17 = vpop.f32.mrf.mxu1 }
 0x16a   : > { %v745_v18 = vadd.f32 %v728_v13, %v672_v17  ;;  %v2050_v17 = vld [vmem:[#allocation4 + $0xb0] ss:$8 sps:$4 sm:$0xff]  }
 0x16b   : > { %v674_v19 = vpop.f32.mrf.mxu1 }
 0x16c   : > { %v757_v20 = vmul.f32 0.01, %v745_v18  ;;  %v746_v21 = vadd.f32 %v732_v16, %v674_v19  ;;  %vm753_vm5 = vcmp.ge.f32.partialorder %v745_v18, 0.0  ;;  %v2053_v19 = vld [vmem:[#allocation4 + $0xa0] ss:$8 sps:$4 sm:$0xff]  }
 0x16d   : > { %v676_v22 = vpop.f32.mrf.mxu1 }
 0x16e   : > { %v758_v23 = vmul.f32 0.01, %v746_v21  ;;  %v749_v24 = vadd.f32 %v728_v13, %v676_v22  ;;  %vm754_vm6 = vcmp.ge.f32.partialorder %v746_v21, 0.0  ;;  %v761_v28 = vsel %vm753_vm5, %v745_v18, %v757_v20  ;;  %v2049_v13 = vld [vmem:[#allocation4 + $0xc4] ss:$8 sps:$4 sm:$0xff]  }
 0x16f   : > { %v678_v25 = vpop.f32.mrf.mxu1  ;;  %v771_v32 = vrot.slane %v761_v28, 1  ;;  %v2055_v18 = vld [vmem:[#allocation4 + $0xa4] ss:$8 sps:$4 sm:$0xff]   ;;  %v2058_v20 = vld [vmem:[#allocation4 + $0x94] ss:$8 sps:$4 sm:$0xff]  }
 0x170   : > { %vm755_vm7 = vcmp.ge.f32.partialorder %v749_v24, 0.0  ;;  %v759_v26 = vmul.f32 0.01, %v749_v24  ;;  %v750_v27 = vadd.f32 %v732_v16, %v678_v25  ;;  %v762_v29 = vsel %vm754_vm6, %v746_v21, %v758_v23  ;;  %v2052_v16 = vld [vmem:[#allocation4 + $0xb4] ss:$8 sps:$4 sm:$0xff]  }
 0x171   : > { %v765_v35 = vrot.slane %v762_v29, 7  ;;  %v2056_v21 = vld [vmem:[#allocation4 + $0x90] ss:$8 sps:$4 sm:$0xff]   ;;  %v2059_v22 = vld [vmem:[#allocation4 + $0x80] ss:$8 sps:$4 sm:$0xff]  }
 0x172   : > { %v760_v30 = vmul.f32 0.01, %v750_v27  ;;  %vm756_vm8 = vcmp.ge.f32.partialorder %v750_v27, 0.0  ;;  %v763_v31 = vsel %vm755_vm7, %v749_v24, %v759_v26  ;;  %v2061_v23 = vld [vmem:[#allocation4 + $0x84] ss:$8 sps:$4 sm:$0xff]  }
 0x173   : > { %v772_v33 = vrot.slane %v763_v31, 1  ;;  %v777_v2 = vpack.c.bf16 %v763_v31, %v761_v28  ;;  %v781_v28 = vld [vmem:[%s2495_s4] sm:$0x3] }
 0x174   : > { %v764_v34 = vsel %vm756_vm8, %v750_v27, %v760_v30 }
 0x175   : > { %v766_v36 = vrot.slane %v764_v34, 7  ;;  %v778_v37 = vpack.c.bf16 %v764_v34, %v762_v29  ;;  %v773_v38 = vsel %vm328_vm0, %v771_v32, %v772_v33  ;;  %v774_v39 = vsel %vm328_vm0, %v772_v33, %v771_v32 }
 0x176   : > { %v1766_v41 = vpack.c.bf16 %v774_v39, %v773_v38  ;;  %v1260_v32 = vrot.slane %v781_v28, %v2431_v15  ;;  %v1256_v34 = vrot.slane %v781_v28, %v2423_v12 }
 0x177   : > { %v767_v43 = vsel %vm319_vm1, %v765_v35, %v766_v36  ;;  %v768_v44 = vsel %vm319_vm1, %v766_v36, %v765_v35  ;;  %1198 = vmatprep.mubr.bf16.mxu0 %v778_v37 }
 0x178   : > { %v1770_v45 = vpack.c.bf16 %v767_v43, %v768_v44  ;;  %1199 = vmatmul.mubr.bf16.vlgmr.msra.gmra.mxu0 %v777_v2  ;;  %1767 = vmatprep.mubr.msk.bf16.mxu1 %vm1765_vm12, %v1766_v41 }
 0x179   : > { %1478 = vmatpush1.bf16.msra.mxu0 %v2014_v40 }
 0x17a   : > { %1771 = vmatmul.mubr.msk.bf16.vlgmr.msra.gmra.mxu1 %vm1769_vm13, %v1770_v45  ;;  %1479 = vmatprep.subr.bf16.mxu0 %v2019_v42 }
 0x17d   : > { %1480 = vmatpush1.bf16.msra.mxu0 %v2017_v46 }
 0x17e   : > { %1481 = vmatprep.subr.bf16.mxu0 %v2022_v47 }
 0x181   : > { %1482 = vmatpush1.bf16.msra.mxu0 %v2020_v48 }
 0x182   : > { %1483 = vmatprep.subr.bf16.mxu0 %v2025_v49  ;;  %v1305_v49 = vld [vmem:[%s2497_s6] sm:$0x3] }
 0x185   : > { %1484 = vmatpush1.bf16.msra.mxu0 %v2023_v50  ;;  %v1310_v50 = vrot.slane %v1305_v49, %v2423_v12 }
 0x186   : > { %1485 = vmatprep.subr.bf16.mxu0 %v2028_v51 }
 0x189   : > { %1486 = vmatpush1.bf16.msra.mxu0 %v2026_v52  ;;  %v1314_v52 = vrot.slane %v1305_v49, %v2431_v15 }
 0x18a   : > { %1487 = vmatprep.subr.bf16.mxu0 %v2031_v53 }
 0x18d   : > { %1488 = vmatpush1.bf16.msra.mxu0 %v2029_v54 }
 0x18e   : > { %1489 = vmatprep.subr.bf16.mxu0 %v2034_v55 }
 0x191   : > { %1490 = vmatpush1.bf16.msra.mxu0 %v2032_v56 }
 0x192   : > { %1491 = vmatprep.subr.bf16.mxu0 %v2037_v57 }
 0x195   : > { %1492 = vmatpush1.bf16.msra.mxu0 %v2035_v58 }
 0x196   : > { %1493 = vmatprep.subr.bf16.mxu0 %v2040_v60 }
 0x199   : > { %v715_v4 = vpop.f32.mrf.mxu1  ;;  %1494 = vmatpush2.bf16.msra.mxu0 %v2038_v62 }
 0x19a   : > { %v2455_v6 = vadd.f32 %v736_v63, %v715_v4  ;;  %1495 = vmatprep.subr.bf16.mxu0 %v2043_v0 }
 0x19b   : > { %v717_v8 = vpop.f32.mrf.mxu1 }
 0x19c   : > { %v2458_v9 = vadd.f32 %v2453_v3, %v717_v8 }
 0x19d   : > { %v719_v1 = vpop.f32.mrf.mxu1  ;;  %1496 = vmatpush2.bf16.msra.mxu0 %v2041_v5 }
 0x19e   : > { %v2460_v11 = vadd.f32 %v736_v63, %v719_v1  ;;  %1497 = vmatprep.subr.bf16.mxu0 %v2046_v7 }
 0x19f   : > { %v2462_v24 = vpop.f32.mrf.mxu1 }
 0x1a1   : > { %1498 = vmatpush2.bf16.msra.mxu0 %v2044_v10 }
 0x1a2   : > { %1499 = vmatprep.subr.bf16.mxu0 %v2049_v13 }
 0x1a5   : > { %1500 = vmatpush2.bf16.msra.mxu0 %v2047_v14 }
 0x1a6   : > { %1501 = vmatprep.subr.bf16.mxu0 %v2052_v16 }
 0x1a9   : > { %1502 = vmatpush2.bf16.msra.mxu0 %v2050_v17 }
 0x1aa   : > { %1503 = vmatprep.subr.bf16.mxu0 %v2055_v18 }
 0x1ad   : > { %1504 = vmatpush2.bf16.msra.mxu0 %v2053_v19 }
 0x1ae   : > { %1505 = vmatprep.subr.bf16.mxu0 %v2058_v20 }
 0x1b1   : > { %1506 = vmatpush2.bf16.msra.mxu0 %v2056_v21 }
 0x1b2   : > { %1507 = vmatprep.subr.bf16.mxu0 %v2061_v23 }
 0x1b5   : > { %1508 = vmatpush2.bf16.msra.mxu0 %v2059_v22 }
 0x238   : > { %v1200_v25 = vpop.f32.mrf.mxu0 }
 0x23a   : > { %v1202_v26 = vpop.f32.mrf.mxu0  ;;  %v1243_v27 = vpop.f32.mrf.mxu1 }
 0x23b   : > { %v1244_v33 = vadd.f32 %v1243_v27, %v1200_v25 }
 0x23c   : > { %v1204_v29 = vpop.f32.mrf.mxu0  ;;  %v1245_v30 = vpop.f32.mrf.mxu1 }
 0x23d   : > { %v1246_v31 = vadd.f32 %v1245_v30, %v1202_v26  ;;  %v1263_v41 = vadd.f32 %v1256_v34, %v1244_v33 }
 0x23e   : > { %v1247_v35 = vpop.f32.mrf.mxu1  ;;  %v1206_v37 = vpop.f32.mrf.mxu0 }
 0x23f   : > { %v1248_v36 = vadd.f32 %v1247_v35, %v1204_v29  ;;  %v1264_v39 = vadd.f32 %v1260_v32, %v1246_v31  ;;  %v1267_v46 = vmul.f32 %v1263_v41, %v1263_v41 }
 0x240   : > { %v1249_v38 = vpop.f32.mrf.mxu1 }
 0x241   : > { %v1265_v40 = vadd.f32 %v1256_v34, %v1248_v36  ;;  %v1250_v2 = vadd.f32 %v1249_v38, %v1206_v37  ;;  %v1268_v44 = vmul.f32 %v1264_v39, %v1264_v39 }
 0x243   : > { %v2469_v42 = vadd.f32 %v1260_v32, %v1250_v2  ;;  %v1269_v43 = vmul.f32 %v1265_v40, %v1265_v40 }
 0x245   : > { %v1270_v45 = vmul.f32 %v2469_v42, %v2469_v42  ;;  %v1271_v48 = vpack.c.bf16 %v1269_v43, %v1267_v46 }
 0x247   : > { %v1272_v47 = vpack.c.bf16 %v1270_v45, %v1268_v44 }
 0x249   : > { %1509 = vmatprep.mubr.bf16.mxu0 %v1272_v47 }
 0x24a   : > { %1510 = vmatmul.mubr.bf16.vlgmr.msra.gmra.mxu0 %v1271_v48 }
 0x30a   : > { %v1511_v51 = vpop.f32.mrf.mxu0 }
 0x30b   : > { %v1512_v53 = vadd.f32 %v1511_v51, %v1310_v50 }
 0x30c   : > { %v1513_v54 = vpop.f32.mrf.mxu0 }
 0x30d   : > { %2062 = vrsqrt.f32 %v1512_v53  ;;  %v1514_v55 = vadd.f32 %v1513_v54, %v1314_v52  ;;  %vm1522_vm14 = vcmp.eq.f32.partialorder %v1512_v53, inf  ;;  %v1525_v62 = vand.u32 2147483648, %v1512_v53 }
 0x30e   : > { %v1515_v56 = vpop.f32.mrf.mxu0  ;;  %vm1524_vm15 = vcmp.eq.f32.partialorder %v1512_v53, 0.0 }
 0x30f   : > { %v1516_v57 = vadd.f32 %v1515_v56, %v1310_v50  ;;  %2064 = vrsqrt.f32 %v1514_v55  ;;  %vm1529_vm0 = vcmp.eq.f32.partialorder %v1514_v55, inf  ;;  %v1532_v7 = vand.u32 2147483648, %v1514_v55 }
 0x310   : > { %v1517_v58 = vpop.f32.mrf.mxu0  ;;  %vm1531_vm1 = vcmp.eq.f32.partialorder %v1514_v55, 0.0 }
 0x311   : > { %2066 = vrsqrt.f32 %v1516_v57  ;;  %v1518_v59 = vadd.f32 %v1517_v58, %v1314_v52  ;;  %vm1536_vm2 = vcmp.eq.f32.partialorder %v1516_v57, inf  ;;  %v1539_v10 = vand.u32 2147483648, %v1516_v57 }
 0x312   : > { %vm1538_vm3 = vcmp.eq.f32.partialorder %v1516_v57, 0.0 }
 0x313   : > { %2068 = vrsqrt.f32 %v1518_v59  ;;  %vm1543_vm4 = vcmp.eq.f32.partialorder %v1518_v59, inf  ;;  %v1546_v22 = vand.u32 2147483648, %v1518_v59  ;;  %vm1545_vm5 = vcmp.eq.f32.partialorder %v1518_v59, 0.0 }
 0x31a   : > { %v2063_v60 = vpop.eup %2062 }
 0x31b   : > { %v1521_v61 = vmul.f32 %v2063_v60, %v1512_v53 }
 0x31c   : > { %v2065_v12 = vpop.eup %2064 }
 0x31d   : > { %v1523_v63 = vsel %vm1522_vm14, %v1512_v53, %v1521_v61  ;;  %v1528_v4 = vmul.f32 %v2065_v12, %v1514_v55 }
 0x31e   : > { %v2067_v15 = vpop.eup %2066  ;;  %v1526_v0 = vsel %vm1524_vm15, %v1525_v62, %v1523_v63 }
 0x31f   : > { %v1548_v5 = vmul.f32 %v1526_v0, %v1263_v41  ;;  %v1535_v8 = vmul.f32 %v2067_v15, %v1516_v57  ;;  %v1530_v1 = vsel %vm1529_vm0, %v1514_v55, %v1528_v4 }
 0x320   : > { %v2069_v13 = vpop.eup %2068  ;;  %v1533_v16 = vsel %vm1531_vm1, %v1532_v7, %v1530_v1 }
 0x321   : > { %v1552_v14 = vadd.f32 %v1548_v5, %v2455_v6  ;;  %v1537_v17 = vsel %vm1536_vm2, %v1516_v57, %v1535_v8  ;;  %v1549_v18 = vmul.f32 %v1533_v16, %v1264_v39  ;;  %v1542_v20 = vmul.f32 %v2069_v13, %v1518_v59 }
 0x322   : > { %v1540_v19 = vsel %vm1538_vm3, %v1539_v10, %v1537_v17  ;;  %v752_v6 = vadd.f32 %v2453_v3, %v2462_v24 }
 0x323   : > { %1556 = vst [vmem:[%s308_s22] sm:$0xff] %v1552_v14  ;;  %v1550_v21 = vmul.f32 %v1540_v19, %v1265_v40  ;;  %v1553_v23 = vadd.f32 %v1549_v18, %v2458_v9  ;;  %v1544_v25 = vsel %vm1543_vm4, %v1518_v59, %v1542_v20 }
 0x324   : > { %v1547_v27 = vsel %vm1545_vm5, %v1546_v22, %v1544_v25 }
 0x325   : > { %v1554_v26 = vadd.f32 %v1550_v21, %v2460_v11  ;;  %1557 = vst [vmem:[%s308_s22 + $0x8] sm:$0xff] %v1553_v23  ;;  %v1551_v28 = vmul.f32 %v1547_v27, %v2469_v42 }
 0x327   : > { %1558 = vst [vmem:[%s308_s22 + $0x10] sm:$0xff] %v1554_v26  ;;  %v1555_v29 = vadd.f32 %v1551_v28, %v752_v6 }
 0x329   : > { %1559 = vst [vmem:[%s308_s22 + $0x18] sm:$0xff] %v1555_v29 }
 0x32a PF: > { %s19_s24 = sadd.s32 1, %s2136_s24  }
 0x32b   : > { %p16_p2 = scmp.ge.s32.totalorder %s19_s24, 4  }
 0x32d   :  { %18 = sbr.rel (!%p16_p2) target bundleno = 2 (0x2), region = 87 }
 0x332   :  { %1581 = vsyncpa [#allocation3], 1 }
 0x333   :  { %1583 = vsyncpa [#allocation3 + $0x1], 1 }
 0x334   :  { %1584 = vsyncpa [#allocation5], 1 }

</bundles_post_ra>
